<compile_context>
chip_gen: v7x
topology: tpu7x:2x2x1
jax: 0.10.0
libtpu: 0.0.40
codegen_flags: <defaults>
</compile_context>

<pallas_src>
import functools
import math

import jax
import jax.numpy as jnp
from jax.experimental import pallas as pl
from jax.experimental.pallas import tpu as pltpu


# ---------------------------------------------------------------------------
# Pallas kernel: full interaction-network hot path on one row tile.
# ---------------------------------------------------------------------------
def interaction_kernel(x_ref, w_ref, b_ref, out_ref, *, emb, feat):
    E, F = emb, feat
    r1 = 2 * F            # end of fused layer-0 weights
    r2 = r1 + 4 * E       # end of fused layer-1 weights
    r3 = r2 + 4 * E       # end of fused affector-0 weights

    x = x_ref[...]                                    # (T, 2F) = [puck | goal]
    w0 = w_ref[0:r1, :]                               # (2F, 4E)
    w1 = w_ref[r1:r2, :]                              # (4E, 4E)  (residual identity folded)
    wa0 = w_ref[r2:r3, 0:2 * E]                       # (4E, 2E)  (slot split folded)
    wa1 = w_ref[r3:r3 + 2 * E, 0:E]                   # (2E,  E)  (residual + mean folded)
    b0 = b_ref[0:1, :]                                # (1, 4E)
    b1 = b_ref[1:2, :]                                # (1, 4E)
    ba0 = b_ref[2:3, 0:2 * E]                         # (1, 2E)
    ba1 = b_ref[3:4, 0:E]                             # (1,  E)

    h0 = jnp.maximum(jnp.dot(x, w0, preferred_element_type=jnp.float32) + b0, 0.0)
    h1 = jnp.dot(h0, w1, preferred_element_type=jnp.float32) + b1
    a0 = jnp.maximum(jnp.dot(h1, wa0, preferred_element_type=jnp.float32) + ba0, 0.0)
    out_ref[...] = jnp.dot(a0, wa1, preferred_element_type=jnp.float32) + ba1


# ---------------------------------------------------------------------------
# Parameter construction (PyTorch-Linear-like init, weights stored (in, out)).
# ---------------------------------------------------------------------------
def init_params(key, embedding_size, feature_dims=4):
    names_shapes = [
        ("wsp0", (feature_dims, embedding_size)), ("bsp0", (1, embedding_size)),
        ("wsp1", (embedding_size, embedding_size)), ("bsp1", (1, embedding_size)),
        ("wsg0", (feature_dims, embedding_size)), ("bsg0", (1, embedding_size)),
        ("wsg1", (embedding_size, embedding_size)), ("bsg1", (1, embedding_size)),
        ("wr0", (feature_dims * 2, embedding_size)), ("br0", (1, embedding_size)),
        ("wr1", (embedding_size, embedding_size)), ("br1", (1, embedding_size)),
        ("wa0", (embedding_size, embedding_size)), ("ba0", (1, embedding_size)),
        ("wa1", (embedding_size, embedding_size)), ("ba1", (1, embedding_size)),
    ]
    params = {}
    keys = jax.random.split(key, len(names_shapes))
    for (name, shape), k in zip(names_shapes, keys):
        fan_in = shape[0] if name.startswith("w") else shape[1]
        bound = 1.0 / math.sqrt(fan_in)
        params[name] = jax.random.uniform(
            k, shape, dtype=jnp.float32, minval=-bound, maxval=bound
        )
    return params


def _block_diag(*ms):
    rows = sum(m.shape[0] for m in ms)
    cols = sum(m.shape[1] for m in ms)
    out = jnp.zeros((rows, cols), jnp.float32)
    r = c = 0
    for m in ms:
        out = out.at[r:r + m.shape[0], c:c + m.shape[1]].set(m)
        r += m.shape[0]
        c += m.shape[1]
    return out


def pack_params(p, E, F):
    """Pack the 16 Linear params into one weight slab + one bias slab."""
    f32 = jnp.float32
    zF = jnp.zeros((F, E), f32)

    # Layer 0 (2F, 4E) on input [puck | goal]:
    #   cols  0:E   self_puck <- puck @ wsp0
    #   cols  E:2E  self_goal <- puck @ wsg0   (module quirk: goal core sees puck_x)
    #   cols 2E:3E  rel(p,g)  <- [puck|goal] @ wr0
    #   cols 3E:4E  rel(g,p)  <- [goal|puck] @ wr0
    w0 = jnp.concatenate([
        jnp.concatenate([p["wsp0"], zF], axis=0),
        jnp.concatenate([p["wsg0"], zF], axis=0),
        p["wr0"],
        jnp.concatenate([p["wr0"][F:], p["wr0"][:F]], axis=0),
    ], axis=1)
    b0 = jnp.concatenate([p["bsp0"], p["bsg0"], p["br0"], p["br0"]], axis=1)

    # Layer 1: block-diag with the residual folded as +I.
    w1 = _block_diag(p["wsp1"], p["wsg1"], p["wr1"], p["wr1"]) + jnp.eye(4 * E, dtype=f32)
    b1 = jnp.concatenate([p["bsp1"], p["bsg1"], p["br1"], p["br1"]], axis=1)

    # Affector layer 0 with the slot split folded:
    #   slot0 = (p1 + obj1) @ wa0 + ba0 ; slot1 = (g1 + obj2) @ wa0 + ba0
    bd_a0 = _block_diag(p["wa0"], p["wa0"])                    # (2E, 2E)
    wa0 = jnp.concatenate([bd_a0, bd_a0], axis=0)              # (4E, 2E)
    ba0 = jnp.concatenate([p["ba0"], p["ba0"]], axis=1)        # (1, 2E)

    # Affector layer 1 with the residual and the mean over the 2 slots folded.
    wa1_res = p["wa1"] + jnp.eye(E, dtype=f32)
    wa1 = 0.5 * jnp.concatenate([wa1_res, wa1_res], axis=0)    # (2E, E)
    ba1 = p["ba1"]                                             # (1, E)

    # Pack: one (2F + 10E, 4E) weight slab + one (4, 4E) bias slab.
    wa0_pad = jnp.concatenate([wa0, jnp.zeros((4 * E, 2 * E), f32)], axis=1)
    wa1_pad = jnp.concatenate([wa1, jnp.zeros((2 * E, 3 * E), f32)], axis=1)
    wpack = jnp.concatenate([w0, w1, wa0_pad, wa1_pad], axis=0)

    ba0_pad = jnp.concatenate([ba0, jnp.zeros((1, 2 * E), f32)], axis=1)
    ba1_pad = jnp.concatenate([ba1, jnp.zeros((1, 3 * E), f32)], axis=1)
    bpack = jnp.concatenate([b0, b1, ba0_pad, ba1_pad], axis=0)
    return wpack, bpack


# ---------------------------------------------------------------------------
# Wrapper: row-tiled pallas_call.
# ---------------------------------------------------------------------------
@functools.partial(jax.jit,
                   static_argnames=("embedding_size", "feature_dims", "row_tile"))
def bbox_interaction_forward(x, params, *, embedding_size, feature_dims=4,
                             row_tile=1024):
    b, t, c, h, w = x.shape
    assert h == 2 and w == feature_dims, "module assumes 2 bboxes x feature_dims"
    E, F = embedding_size, feature_dims
    n = b * t * c

    xf = x.reshape(n, h, w).astype(jnp.float32)        # "frames" output
    xf2 = xf.reshape(n, 2 * F)                         # (N, 2F) = [puck | goal]

    # Row tile: multiple of 8 sublanes, no bigger than the padded row count.
    tile = min(int(row_tile), pl.cdiv(n, 8) * 8)
    n_pad = pl.cdiv(n, tile) * tile
    if n_pad != n:
        xf2 = jnp.pad(xf2, ((0, n_pad - n), (0, 0)))

    wpack, bpack = pack_params(params, E, F)

    kernel = functools.partial(interaction_kernel, emb=E, feat=F)
    out = pl.pallas_call(
        kernel,
        out_shape=jax.ShapeDtypeStruct((n_pad, E), jnp.float32),
        grid=(n_pad // tile,),
        in_specs=[
            pl.BlockSpec((tile, 2 * F), lambda i: (i, 0)),   # per-tile rows
            pl.BlockSpec(wpack.shape, lambda i: (0, 0)),     # resident weight slab
            pl.BlockSpec(bpack.shape, lambda i: (0, 0)),     # resident bias slab
        ],
        out_specs=pl.BlockSpec((tile, E), lambda i: (i, 0)),
        compiler_params=pltpu.CompilerParams(
            dimension_semantics=("parallel",),               # megacore on v7x
            vmem_limit_bytes=32 * 1024 * 1024,
        ),
    )(xf2, wpack, bpack)

    embs = out[:n].reshape(b, t, c * E)
    return xf, embs


# ---------------------------------------------------------------------------
# Pure-JAX reference (mirrors the PyTorch forward exactly) for verification.
# ---------------------------------------------------------------------------
def reference_forward(x, params, embedding_size):
    hp = jax.lax.Precision.HIGHEST
    b, t, c, h, w = x.shape
    n = b * t * c
    xf = x.reshape(n, h, w).astype(jnp.float32)
    puck = xf[:, 0, :]

    def lin(v, wname, bname):
        return jnp.dot(v, params[wname], precision=hp) + params[bname]

    p0 = jax.nn.relu(lin(puck, "wsp0", "bsp0"))
    p1 = lin(p0, "wsp1", "bsp1") + p0
    g0 = jax.nn.relu(lin(puck, "wsg0", "bsg0"))        # module quirk: uses puck_x
    g1 = lin(g0, "wsg1", "bsg1") + g0

    comb01 = jnp.concatenate([xf[:, 0, :], xf[:, 1, :]], axis=-1)
    comb10 = jnp.concatenate([xf[:, 1, :], xf[:, 0, :]], axis=-1)
    relc = jnp.concatenate([comb01, comb10], axis=0)
    r0 = jax.nn.relu(lin(relc, "wr0", "br0"))
    r1 = lin(r0, "wr1", "br1") + r0
    obj1, obj2 = r1[:n], r1[n:]

    self_dyn = jnp.stack([p1, g1], axis=1)
    rel_dyn = jnp.stack([obj1, obj2], axis=1)
    dyn = (self_dyn + rel_dyn).reshape(-1, embedding_size)

    a0 = jax.nn.relu(lin(dyn, "wa0", "ba0"))
    a1 = lin(a0, "wa1", "ba1") + a0
    final = jnp.mean(a1.reshape(-1, 2, embedding_size), axis=1)
    return xf, final.reshape(b, t, -1)


if __name__ == "__main__":
    embedding_size = 32
    feature_dims = 4

    key = jax.random.PRNGKey(0)
    kx1, kx2, kp = jax.random.split(key, 3)
    params = init_params(kp, embedding_size, feature_dims)

    # Small shape (single tile): b=2, t=8, c=1, h=2 bboxes, w=4 feats.
    b, t, c = 2, 8, 1
    x1 = jax.random.normal(kx1, (b, t, c, 2, feature_dims), dtype=jnp.float32)
    frames1, embs1 = bbox_interaction_forward(
        x1, params, embedding_size=embedding_size, feature_dims=feature_dims)
    embs1 = jax.block_until_ready(embs1)
    ref_frames1, ref_embs1 = reference_forward(x1, params, embedding_size)
    assert embs1.shape == (b, t, c * embedding_size)
    assert frames1.shape == (b * t * c, 2, feature_dims)
    assert jnp.allclose(embs1, ref_embs1, atol=1e-4, rtol=1e-4)
    assert jnp.allclose(frames1, ref_frames1)

    # Shape that exercises the row grid + padding path (N=26 -> tile 8, grid 4).
    b2, t2, c2 = 2, 13, 1
    x2 = jax.random.normal(kx2, (b2, t2, c2, 2, feature_dims), dtype=jnp.float32)
    frames2, embs2 = bbox_interaction_forward(
        x2, params, embedding_size=embedding_size, feature_dims=feature_dims,
        row_tile=8)
    embs2 = jax.block_until_ready(embs2)
    ref_frames2, ref_embs2 = reference_forward(x2, params, embedding_size)
    assert jnp.allclose(embs2, ref_embs2, atol=1e-4, rtol=1e-4)
    assert jnp.allclose(frames2, ref_frames2)

    print("KERNEL_OK")
</pallas_src>

<mosaic_0001>
module attributes {stable_mosaic.version = 11 : i64} {
  func.func @interaction_kernel(%arg0: i32, %arg1: memref<16x8xf32, #tpu.memory_space<vmem>>, %arg2: memref<328x128xf32, #tpu.memory_space<vmem>>, %arg3: memref<4x128xf32, #tpu.memory_space<vmem>>, %arg4: memref<16x32xf32, #tpu.memory_space<vmem>>) attributes {dimension_semantics = [#tpu.dimension_semantics<parallel>], iteration_bounds = array<i64: 1>, scalar_prefetch = 0 : i64, scratch_operands = 0 : i64, tpu.core_type = #tpu.core_type<tc>, window_params = [{transform_indices = @transform_0, window_bounds = array<i64: 16, 8>}, {pipeline_mode = #tpu.pipeline_mode<synchronous>, transform_indices = @transform_1, window_bounds = array<i64: 328, 128>}, {pipeline_mode = #tpu.pipeline_mode<synchronous>, transform_indices = @transform_2, window_bounds = array<i64: 4, 128>}, {transform_indices = @transform_3, window_bounds = array<i64: 16, 32>}]} {
    %c0 = arith.constant 0 : index
    %c0_0 = arith.constant 0 : index
    %0 = vector.load %arg1[%c0, %c0_0] : memref<16x8xf32, #tpu.memory_space<vmem>>, vector<16x8xf32>
    %c0_1 = arith.constant 0 : index
    %c0_2 = arith.constant 0 : index
    %1 = vector.load %arg2[%c0_1, %c0_2] : memref<328x128xf32, #tpu.memory_space<vmem>>, vector<8x128xf32>
    %c8 = arith.constant 8 : index
    %c0_3 = arith.constant 0 : index
    %2 = vector.load %arg2[%c8, %c0_3] : memref<328x128xf32, #tpu.memory_space<vmem>>, vector<128x128xf32>
    %c136 = arith.constant 136 : index
    %c0_4 = arith.constant 0 : index
    %3 = vector.load %arg2[%c136, %c0_4] : memref<328x128xf32, #tpu.memory_space<vmem>>, vector<128x64xf32>
    %c264 = arith.constant 264 : index
    %c0_5 = arith.constant 0 : index
    %4 = vector.load %arg2[%c264, %c0_5] : memref<328x128xf32, #tpu.memory_space<vmem>>, vector<64x32xf32>
    %c0_6 = arith.constant 0 : index
    %c0_7 = arith.constant 0 : index
    %5 = vector.load %arg3[%c0_6, %c0_7] : memref<4x128xf32, #tpu.memory_space<vmem>>, vector<1x128xf32>
    %c1 = arith.constant 1 : index
    %c0_8 = arith.constant 0 : index
    %6 = vector.load %arg3[%c1, %c0_8] : memref<4x128xf32, #tpu.memory_space<vmem>>, vector<1x128xf32>
    %c2 = arith.constant 2 : index
    %c0_9 = arith.constant 0 : index
    %7 = vector.load %arg3[%c2, %c0_9] : memref<4x128xf32, #tpu.memory_space<vmem>>, vector<1x64xf32>
    %c3 = arith.constant 3 : index
    %c0_10 = arith.constant 0 : index
    %8 = vector.load %arg3[%c3, %c0_10] : memref<4x128xf32, #tpu.memory_space<vmem>>, vector<1x32xf32>
    %cst = arith.constant dense<0.000000e+00> : vector<16x128xf32>
    %9 = tpu.matmul %0, %1, %cst {dimension_numbers = #tpu.dot_dimension_numbers<[1], [0], [0], [1], [0, 0, 1, 1], [], []>} : vector<16x8xf32>, vector<8x128xf32>, vector<16x128xf32> -> vector<16x128xf32>
    %10 = vector.broadcast %5 : vector<1x128xf32> to vector<16x128xf32>
    %11 = arith.addf %9, %10 : vector<16x128xf32>
    %cst_11 = arith.constant 0.000000e+00 : f32
    %12 = vector.broadcast %cst_11 : f32 to vector<16x128xf32>
    %13 = arith.maximumf %11, %12 : vector<16x128xf32>
    %cst_12 = arith.constant dense<0.000000e+00> : vector<16x128xf32>
    %14 = tpu.matmul %13, %2, %cst_12 {dimension_numbers = #tpu.dot_dimension_numbers<[1], [0], [0], [1], [0, 0, 1, 1], [], []>} : vector<16x128xf32>, vector<128x128xf32>, vector<16x128xf32> -> vector<16x128xf32>
    %15 = vector.broadcast %6 : vector<1x128xf32> to vector<16x128xf32>
    %16 = arith.addf %14, %15 : vector<16x128xf32>
    %cst_13 = arith.constant dense<0.000000e+00> : vector<16x64xf32>
    %17 = tpu.matmul %16, %3, %cst_13 {dimension_numbers = #tpu.dot_dimension_numbers<[1], [0], [0], [1], [0, 0, 1, 1], [], []>} : vector<16x128xf32>, vector<128x64xf32>, vector<16x64xf32> -> vector<16x64xf32>
    %18 = vector.broadcast %7 : vector<1x64xf32> to vector<16x64xf32>
    %19 = arith.addf %17, %18 : vector<16x64xf32>
    %cst_14 = arith.constant 0.000000e+00 : f32
    %20 = vector.broadcast %cst_14 : f32 to vector<16x64xf32>
    %21 = arith.maximumf %19, %20 : vector<16x64xf32>
    %cst_15 = arith.constant dense<0.000000e+00> : vector<16x32xf32>
    %22 = tpu.matmul %21, %4, %cst_15 {dimension_numbers = #tpu.dot_dimension_numbers<[1], [0], [0], [1], [0, 0, 1, 1], [], []>} : vector<16x64xf32>, vector<64x32xf32>, vector<16x32xf32> -> vector<16x32xf32>
    %23 = vector.broadcast %8 : vector<1x32xf32> to vector<16x32xf32>
    %24 = arith.addf %22, %23 : vector<16x32xf32>
    %c0_16 = arith.constant 0 : index
    %c0_17 = arith.constant 0 : index
    %25 = vector.load %arg4[%c0_16, %c0_17] : memref<16x32xf32, #tpu.memory_space<vmem>>, vector<16x32xf32>
    tpu.vector_store %arg4[%c0_16, %c0_17], %24 {strides = array<i32>} : memref<16x32xf32, #tpu.memory_space<vmem>>, vector<16x32xf32>,
    return
  }
  func.func @transform_0(%arg0: i32) -> (i32, i32) {
    %c0_i32 = arith.constant 0 : i32
    %c0_i32_0 = arith.constant 0 : i32
    return %arg0, %c0_i32 : i32, i32
  }
  func.func @transform_1(%arg0: i32) -> (i32, i32) {
    %c0_i32 = arith.constant 0 : i32
    %c0_i32_0 = arith.constant 0 : i32
    %c0_i32_1 = arith.constant 0 : i32
    return %c0_i32, %c0_i32_0 : i32, i32
  }
  func.func @transform_2(%arg0: i32) -> (i32, i32) {
    %c0_i32 = arith.constant 0 : i32
    %c0_i32_0 = arith.constant 0 : i32
    %c0_i32_1 = arith.constant 0 : i32
    return %c0_i32, %c0_i32_0 : i32, i32
  }
  func.func @transform_3(%arg0: i32) -> (i32, i32) {
    %c0_i32 = arith.constant 0 : i32
    %c0_i32_0 = arith.constant 0 : i32
    return %arg0, %c0_i32 : i32, i32
  }
}

</mosaic_0001>

<bundles_post_ra>
// kernel: bbox_interaction_forward.1
= control target key start
LH: loop header
LB: loop body
LE: loop exit
PB: predicated region body
PF: predicated region fallthrough
CT: control target
= control target key end

     0   :  { %vm66_vm0 = vcmask 64512   ;;  %s849_s0 = inlined_call_operand.vmem [shape: f32[16,8], index: 0, kind: input, shape index: {}]   ;;  %s850_s1 = inlined_call_operand.vmem [shape: f32[328,128], index: 1, kind: input, shape index: {}]   ;;  %s851_s2 = inlined_call_operand.vmem [shape: f32[4,128], index: 2, kind: input, shape index: {}]   ;;  %s852_s3 = inlined_call_operand.hbm [shape: f32[16,32], index: 3, kind: output, shape index: {}]  }
   0x1   :  { %v17_v0 = vld [vmem:[%s850_s1] sm:$0xff]  ;;  %v16_v2 = vld [vmem:[%s849_s0 + $0x8] sm:$0xff]  ;;  %v19_v4 = vld [vmem:[%s850_s1 + $0x10] sm:$0xff] }
   0x2   :  { %v15_v1 = vld [vmem:[%s849_s0] sm:$0xff]  ;;  %472 = vmatprep.subr.mxu0 %v17_v0  ;;  %v18_v3 = vld [vmem:[%s850_s1 + $0x8] sm:$0xff]  ;;  %v20_v5 = vld [vmem:[%s850_s1 + $0x18] sm:$0xff] }
   0x3   :  { %474 = vmatprep.mubr.msk.f32.mxu0 %vm66_vm0, %v15_v1  ;;  %473 = vmatpush3.msra.mxu0 %v17_v0  ;;  %v566_v6 = vpack.c.bf16 %v19_v4, %v18_v3  ;;  %v21_v7 = vld [vmem:[%s850_s1 + $0x20] sm:$0xff]  ;;  %v22_v9 = vld [vmem:[%s850_s1 + $0x28] sm:$0xff]  ;;  %v23_v10 = vld [vmem:[%s850_s1 + $0x30] sm:$0xff] }
   0x4   :  { %475 = vmatmul.mubr.msk.f32.vlgmr.msra.gmra.mrb[0].mxu0 %vm66_vm0, %v16_v2  ;;  %v570_v8 = vpack.c.bf16 %v21_v7, %v20_v5 }
   0x5   :  { %567 = vmatprep.subr.bf16.mxu1 %v566_v6 }
   0x6   :  { %569 = vmatpush3.bf16.msra.mxu1 %v566_v6 }
   0x7   :  { %8 = vsyncpa [#allocation3], 0  ;;  %571 = vmatprep.subr.bf16.mxu1 %v570_v8  ;;  %v574_v11 = vpack.c.bf16 %v23_v10, %v22_v9  ;;  %v24_v12 = vld [vmem:[%s850_s1 + $0x38] sm:$0xff]  ;;  %v25_v13 = vld [vmem:[%s850_s1 + $0x40] sm:$0xff]  ;;  %vm314_vm1 = vcmask 523264   ;;  %vm396_vm2 = vcmask 261120  }
   0x8   :  { %v578_v14 = vpack.c.bf16 %v25_v13, %v24_v12  ;;  %v26_v15 = vld [vmem:[%s850_s1 + $0x48] sm:$0xff]  ;;  %v27_v16 = vld [vmem:[%s850_s1 + $0x50] sm:$0xff]  ;;  %v28_v18 = vld [vmem:[%s850_s1 + $0x58] sm:$0xff] }
   0x9   :  { %v582_v17 = vpack.c.bf16 %v27_v16, %v26_v15  ;;  %v29_v19 = vld [vmem:[%s850_s1 + $0x60] sm:$0xff]  ;;  %v30_v21 = vld [vmem:[%s850_s1 + $0x68] sm:$0xff]  ;;  %v31_v22 = vld [vmem:[%s850_s1 + $0x70] sm:$0xff] }
   0xa   :  { %573 = vmatpush3.bf16.msra.mxu1 %v570_v8  ;;  %v586_v20 = vpack.c.bf16 %v29_v19, %v28_v18  ;;  %v590_v23 = vpack.c.bf16 %v31_v22, %v30_v21  ;;  %v32_v24 = vld [vmem:[%s850_s1 + $0x78] sm:$0xff]  ;;  %v33_v25 = vld [vmem:[%s850_s1 + $0x80] sm:$0xff]  ;;  %v34_v27 = vld [vmem:[%s850_s1 + $0x88] sm:$0xff] }
   0xb   :  { %575 = vmatprep.subr.bf16.mxu1 %v574_v11  ;;  %v594_v26 = vpack.c.bf16 %v33_v25, %v32_v24  ;;  %v35_v28 = vld [vmem:[%s850_s1 + $0x90] sm:$0xff]  ;;  %v36_v29 = vld [vmem:[%s850_s1 + $0x98] sm:$0xff]  ;;  %v37_v31 = vld [vmem:[%s850_s1 + $0xa0] sm:$0xff] }
   0xc   :  { %v598_v30 = vpack.c.bf16 %v35_v28, %v34_v27  ;;  %v602_v32 = vpack.c.bf16 %v37_v31, %v36_v29  ;;  %v38_v33 = vld [vmem:[%s850_s1 + $0xa8] sm:$0xff]  ;;  %v39_v34 = vld [vmem:[%s850_s1 + $0xb0] sm:$0xff]  ;;  %v40_v36 = vld [vmem:[%s850_s1 + $0xb8] sm:$0xff] }
   0xd   :  { %v606_v35 = vpack.c.bf16 %v39_v34, %v38_v33  ;;  %v41_v37 = vld [vmem:[%s850_s1 + $0xc0] sm:$0xff]  ;;  %v42_v39 = vld [vmem:[%s850_s1 + $0xc8] sm:$0xff]  ;;  %v43_v40 = vld [vmem:[%s850_s1 + $0xd0] sm:$0xff] }
   0xe   :  { %577 = vmatpush3.bf16.msra.mxu1 %v574_v11  ;;  %599 = vmatprep.subr.bf16.mxu0 %v598_v30  ;;  %v610_v38 = vpack.c.bf16 %v41_v37, %v40_v36  ;;  %v614_v41 = vpack.c.bf16 %v43_v40, %v42_v39  ;;  %v44_v42 = vld [vmem:[%s850_s1 + $0xd8] sm:$0xff]  ;;  %v45_v43 = vld [vmem:[%s850_s1 + $0xe0] sm:$0xff]  ;;  %v46_v45 = vld [vmem:[%s850_s1 + $0xe8] sm:$0xff] }
   0xf   :  { %579 = vmatprep.subr.bf16.mxu1 %v578_v14  ;;  %601 = vmatpush3.bf16.msra.mxu0 %v598_v30  ;;  %v618_v44 = vpack.c.bf16 %v45_v43, %v44_v42  ;;  %v47_v46 = vld [vmem:[%s850_s1 + $0xf0] sm:$0xff]  ;;  %v415_v48 = vld [vmem:[%s851_s2] ss:$0 sm:$0xff]  ;;  %v48_v55 = vld [vmem:[%s850_s1 + $0xf8] sm:$0xff] }
  0x10   :  { %603 = vmatprep.subr.bf16.mxu0 %v602_v32  ;;  %v622_v47 = vpack.c.bf16 %v47_v46, %v46_v45  ;;  %v49_v56 = vld [vmem:[%s850_s1 + $0x100] sm:$0xff]  ;;  %v50_v58 = vld [vmem:[%s850_s1 + $0x108] sm:$0xff]  ;;  %v51_v59 = vld [vmem:[%s850_s1 + $0x110] sm:$0xff] }
  0x11   :  { %v626_v57 = vpack.c.bf16 %v49_v56, %v48_v55  ;;  %v52_v60 = vld [vmem:[%s850_s1 + $0x118] sm:$0xff]  ;;  %v630_v61 = vpack.c.bf16 %v51_v59, %v50_v58  ;;  %v53_v62 = vld [vmem:[%s850_s1 + $0x120] sm:$0xff]  ;;  %v54_v0 = vld [vmem:[%s850_s1 + $0x128] sm:$0xff] }
  0x12   :  { %581 = vmatpush3.bf16.msra.mxu1 %v578_v14  ;;  %v634_v63 = vpack.c.bf16 %v53_v62, %v52_v60  ;;  %v55_v1 = vld [vmem:[%s850_s1 + $0x130] sm:$0xff]  ;;  %v418_v3 = vld [vmem:[%s851_s2 + $0x1] ss:$0 sm:$0xff]  ;;  %v56_v8 = vld [vmem:[%s850_s1 + $0x138] sm:$0xff] }
  0x13   :  { %583 = vmatprep.subr.bf16.mxu1 %v582_v17  ;;  %605 = vmatpush3.bf16.msra.mxu0 %v602_v32  ;;  %v638_v2 = vpack.c.bf16 %v55_v1, %v54_v0  ;;  %v57_v9 = vld [vmem:[%s850_s1 + $0x140] sm:$0xff]  ;;  %s673_s1 = smov [#allocation2]  }
  0x14   :  { %607 = vmatprep.subr.bf16.mxu0 %v606_v35  ;;  %v642_v10 = vpack.c.bf16 %v57_v9, %v56_v8  ;;  %v419_v11 = vld [vmem:[%s851_s2 + $0x2] ss:$0 sm:$0xff]  ;;  %v420_v18 = vld [vmem:[%s851_s2 + $0x3] ss:$0 sm:$0xff]  ;;  %s404_s22 = sshll.u32 %s673_s1, 4  ;;  %s405_s22 = int_to_ptr.vmem [resolvable:$true] %s404_s22 }
  0x15   :  { %s649_s23 = scalar_lea.vmem %s405_s22, 256  ;;  %p654_p1 = scmp.lt.s32.totalorder %s405_s22, %s405_s22 }
  0x16   :  { %585 = vmatpush3.bf16.msra.mxu1 %v582_v17  ;;  %p650_p0 = scmp.ne.s32.totalorder %s405_s22, %s649_s23  ;;  %p655_p2 = scmp.lt.s32.totalorder %s649_s23, %s649_s23 }
  0x17   :  { %587 = vmatprep.subr.bf16.mxu1 %v586_v20  ;;  %609 = vmatpush3.bf16.msra.mxu0 %v606_v35 }
  0x18   :  { %611 = vmatprep.subr.bf16.mxu0 %v610_v38  ;;  %p656_p3 = por %p655_p2, %p654_p1 }
  0x1a   :  { %589 = vmatpush3.bf16.msra.mxu1 %v586_v20  ;;  %p657_p4 = pnand %p656_p3, %p650_p0 }
  0x1b   :  { %591 = vmatprep.subr.bf16.mxu1 %v590_v23  ;;  %613 = vmatpush3.bf16.msra.mxu0 %v610_v38 }
  0x1c   :  { %615 = vmatprep.subr.bf16.mxu0 %v614_v41 }
  0x1e   :  { %593 = vmatpush3.bf16.msra.mxu1 %v590_v23 }
  0x1f   :  { %595 = vmatprep.subr.bf16.mxu1 %v594_v26  ;;  %617 = vmatpush3.bf16.msra.mxu0 %v614_v41 }
  0x20   :  { %619 = vmatprep.subr.bf16.mxu0 %v618_v44 }
  0x22   :  { %597 = vmatpush3.bf16.msra.mxu1 %v594_v26 }
  0x23   :  { %621 = vmatpush3.bf16.msra.mxu0 %v618_v44  ;;  %631 = vmatprep.subr.bf16.mxu1 %v630_v61 }
  0x24   :  { %623 = vmatprep.subr.bf16.mxu0 %v622_v47 }
  0x27   :  { %625 = vmatpush3.bf16.msra.mxu0 %v622_v47 }
  0x28   :  { %627 = vmatprep.subr.bf16.mxu0 %v626_v57 }
  0x2b   :  { %629 = vmatpush3.bf16.msra.mxu0 %v626_v57 }
  0xd7   :  { %v476_v49 = vpop.f32.mrb[0].mxu0 }
  0xd8   :  { %v145_v50 = vadd.f32 %v476_v49, %v415_v48  ;;  %v139_v51 = vpop.f32.mrb[1].mxu0 }
  0xd9   :  { %v140_v52 = vadd.f32 %v415_v48, %v139_v51 }
  0xda   :  { %v149_v54 = vmax.f32 %v145_v50, 0.0 }
  0xdb   :  { %v148_v53 = vmax.f32 %v140_v52, 0.0 }
  0xdd   :  { %509 = vmatprep.mubr.f32.mxu1 %v148_v53 }
  0xde   :  { %510 = vmatmul.mubr.f32.vlgmr.msra.gmra.mrb[0].mxu1 %v149_v54 }
  0xdf   :  { %633 = vmatpush3.bf16.msra.mxu1 %v630_v61 }
  0xe0   :  { %635 = vmatprep.subr.bf16.mxu1 %v634_v63 }
  0xe3   :  { %637 = vmatpush3.bf16.msra.mxu1 %v634_v63 }
  0xe4   :  { %639 = vmatprep.subr.bf16.mxu1 %v638_v2 }
  0xe7   :  { %641 = vmatpush3.bf16.msra.mxu1 %v638_v2 }
  0xe8   :  { %643 = vmatprep.subr.bf16.mxu1 %v642_v10 }
  0xeb   :  { %645 = vmatpush3.bf16.msra.mxu1 %v642_v10 }
 0x1b1   :  { %v511_v4 = vpop.f32.mrb[0].mxu1 }
 0x1b2   :  { %v220_v5 = vpop.f32.mrb[1].mxu1  ;;  %v226_v7 = vadd.f32 %v511_v4, %v418_v3 }
 0x1b3   :  { %v221_v6 = vadd.f32 %v418_v3, %v220_v5 }
 0x1b5   :  { %544 = vmatprep.mubr.f32.mxu0 %v221_v6 }
 0x1b6   :  { %545 = vmatmul.mubr.f32.vlgmr.msra.gmra.mrb[2].mxu0 %v226_v7 }
 0x289   :  { %v546_v12 = vpop.f32.mrb[2].mxu0 }
 0x28a   :  { %v305_v13 = vadd.f32 %v546_v12, %v419_v11  ;;  %v299_v14 = vpop.f32.mrb[3].mxu0 }
 0x28b   :  { %v300_v15 = vadd.f32 %v419_v11, %v299_v14 }
 0x28c   :  { %v309_v17 = vmax.f32 %v305_v13, 0.0 }
 0x28d   :  { %v308_v16 = vmax.f32 %v300_v15, 0.0 }
 0x28f   :  { %563 = vmatprep.mubr.msk.f32.mxu1 %vm314_vm1, %v308_v16 }
 0x290   :  { %564 = vmatmul.mubr.msk.f32.vlgmr.msra.gmra.mrb[2].mxu1 %vm314_vm1, %v309_v17 }
 0x363   :  { %v565_v19 = vpop.f32.mrb[2].mxu1 }
 0x364   :  { %v393_v20 = vadd.f32 %v565_v19, %v420_v18  ;;  %v387_v21 = vpop.f32.mrb[3].mxu1 }
 0x365   :  { %v388_v22 = vadd.f32 %v420_v18, %v387_v21 }
 0x366   :  { %398 = vst.msk [vmem:[#allocation2 + $0x8] sm:$0xff] %vm396_vm2, %v393_v20 }
 0x367   :  { %397 = vst.msk [vmem:[#allocation2] sm:$0xff] %vm396_vm2, %v388_v22 }
 0x368   :  { %660 = shalt.err (!%p657_p4)
}
 0x369   :  { %s661_s2 = scalar_lea.hbm %s852_s3, 256 }
 0x36a   :  { %p662_p5 = scmp.ne.s32.totalorder %s852_s3, %s661_s2  ;;  %p665_p6 = scmp.lt.u32.totalorder %s661_s2, %s852_s3 }
 0x36c   :  { %p667_p7 = pnand %p665_p6, %p662_p5 }
 0x36e   :  { %670 = shalt.err (!%p667_p7)
}
 0x36f   :  { %s674_s29 = smov 128   ;;  %s675_s30 = smov 8  }
 0x370   :  { %410 = dma.vmem_to_hbm [thread:$0]  %s405_s22, 256, %s852_s3, [#allocation3], %s674_s29, %s674_s29, %s675_s30  }
 0x371   :  { %671 = dma.done.wait [#allocation3], 256  }
 0x372   :  { %672 = vsyncadd [#allocation3], 4294967040 }
 0x373   :  { %414 = vsyncpa [#allocation3], 1 }

</bundles_post_ra>
